<compile_context>
chip_gen: v7x
topology: tpu7x:2x2x1
jax: 0.10.0
libtpu: 0.0.40
codegen_flags: <defaults>
</compile_context>

<pallas_src>
import functools
import math

import jax
import jax.numpy as jnp
import numpy as np
from jax.experimental import pallas as pl
from jax.experimental.pallas import tpu as pltpu


def build_positional_encoding(max_seq_len: int, embed_size: int) -> jnp.ndarray:
    """Vectorized replica of the PyTorch module's pe table.  NOTE: it keeps
    the module's original exponent convention (raw even column index for sin,
    i+1 for cos), which is NOT the canonical Vaswani pairing — intentional
    parity with the reference module."""
    if embed_size % 2 != 0:
        raise ValueError("embed_size must be even (module writes pe[pos, i+1])")
    pos = np.arange(max_seq_len, dtype=np.float64)[:, None]          # (S, 1)
    i = np.arange(0, embed_size, 2, dtype=np.float64)[None, :]       # (1, E/2)
    pe = np.zeros((max_seq_len, embed_size), dtype=np.float64)
    pe[:, 0::2] = np.sin(pos / 10000 ** (2 * i / embed_size))
    pe[:, 1::2] = np.cos(pos / 10000 ** (2 * (i + 1) / embed_size))
    return jnp.asarray(pe, dtype=jnp.float32)[None, :, :]            # (1, S, E)


def _pos_enc_kernel(x_ref, pe_ref, o_ref, *, scale: float):
    # Elementwise hot path: scale * x + pe.
    # x_ref/o_ref: (Bt, Lt); pe_ref: (1, Lt) — jnp broadcasting covers batch.
    o_ref[...] = scale * x_ref[...] + pe_ref[...]


def _vmem_capacity_bytes() -> int:
    """Per-core VMEM capacity; conservative 64 MiB (v7x) fallback."""
    try:
        cap = getattr(pltpu.get_tpu_info(), "vmem_capacity_bytes", None)
        if cap:
            return int(cap)
    except Exception:
        pass
    return 64 << 20


def _legal_row_blocks(n: int, sublane: int):
    """Legal second-to-last block sizes: full extent, or a divisor of n that
    is a multiple of the dtype's sublane count."""
    cands = {n}
    d = sublane
    while d < n:
        if n % d == 0:
            cands.add(d)
        d += sublane
    return sorted(cands)


def _legal_lane_blocks(n: int):
    """Legal last-dim block sizes: divisors of n that are multiples of 128
    (n is pre-padded to a multiple of 128, so n itself always qualifies)."""
    cands = {n}
    d = 128
    while d < n:
        if n % d == 0:
            cands.add(d)
        d += 128
    return sorted(cands)


def _choose_tiles(B: int, L: int, itemsize: int, sublane: int, *,
                  max_tile_bytes: int, vmem_budget_bytes: int):
    """Pick (Bt, Lt).  Score = (min(total_steps, 4), tile_bytes): first make
    sure there are >=4 grid steps (>=2 per TensorCore on v7x, and enough to
    keep the DMA pipeline ahead of compute), then take the biggest tile.
    The footprint check includes the sublane-padded pe buffers."""
    lane_cands = sorted(_legal_lane_blocks(L), reverse=True)
    row_cands = sorted(_legal_row_blocks(B, sublane), reverse=True)
    best = None
    for Lt in lane_cands:
        for Bt in row_cands:
            tile = Bt * Lt * itemsize
            if tile > max_tile_bytes:
                continue
            nl, nb = L // Lt, B // Bt
            pe_bufs = 1 if nl == 1 else 2                 # Buffered(1) when grid-invariant
            pe_block = sublane * Lt * itemsize            # (1, Lt) pads to (sublane, Lt)
            footprint = 4 * tile + pe_bufs * pe_block + (1 << 20)
            if footprint > vmem_budget_bytes:
                continue
            score = (min(nl * nb, 4), tile)
            if best is None or score > best[0]:
                best = (score, Bt, Lt)
    if best is None:
        # Pathological shape fallback: smallest legal blocks (still correct;
        # vmem_limit below is clamped to the generation's safe ceiling).
        return min(row_cands), min(lane_cands)
    return best[1], best[2]


def positional_encoder(x: jnp.ndarray, pe: jnp.ndarray, *,
                       donate_x: bool = False) -> jnp.ndarray:
    """x: (B, S, E); pe: (1, S, E).  Returns sqrt(E) * x + pe."""
    B, S, E = x.shape
    assert pe.shape == (1, S, E)
    scale = math.sqrt(E)                       # module defines d_model = embed_size

    itemsize = jnp.dtype(x.dtype).itemsize
    sublane = max(8, 32 // itemsize)           # 8 f32 / 16 bf16 / 32 int8

    # Lane-dense layout: flatten (S, E) into one lane dimension (free layout
    # plumbing for an elementwise op), then pad to a multiple of 128 so every
    # store is a full-width unmasked vst for any (S, E).
    L = S * E
    x2 = x.reshape(B, L)
    pe2 = pe.reshape(1, L).astype(x.dtype)
    L_pad = ((L + 127) // 128) * 128
    if L_pad != L:
        x2 = jnp.pad(x2, ((0, 0), (0, L_pad - L)))
        pe2 = jnp.pad(pe2, ((0, 0), (0, L_pad - L)))

    # Generation-aware budgets.
    cap = _vmem_capacity_bytes()
    cap_limit = (cap * 3) // 4                 # 48 MiB on v7x, 96 MiB on v5e/v6e
    max_tile = (4 << 20) if cap <= (64 << 20) else (8 << 20)

    # Pad batch to a sublane multiple only when its sole legal row block (full
    # B) could not fit even a 128-wide lane tile — i.e. huge, awkward batch.
    B_pad = B
    if min(_legal_row_blocks(B, sublane)) * 128 * itemsize > max_tile:
        B_pad = ((B + sublane - 1) // sublane) * sublane
        x2 = jnp.pad(x2, ((0, B_pad - B), (0, 0)))

    Bt, Lt = _choose_tiles(B_pad, L_pad, itemsize, sublane,
                           max_tile_bytes=max_tile, vmem_budget_bytes=cap_limit)
    nL, nB = L_pad // Lt, B_pad // Bt
    # Lane axis OUTER, batch axis INNER: pe's block index (0, l) is constant
    # across consecutive inner steps, so Pallas skips its re-fetch and total
    # pe traffic is ~L bytes instead of (B//Bt)*L.
    grid = (nL, nB)

    pe_bufs = 1 if nL == 1 else 2
    pe_kwargs = {"pipeline_mode": pl.Buffered(1)} if nL == 1 else {}
    pe_spec = pl.BlockSpec((1, Lt), lambda l, b: (0, l), **pe_kwargs)

    # VMEM budget: double-buffered x + out tiles, plus the pe block at its
    # *sublane-padded* size, plus slack.  Clamp to the generation's safe
    # ceiling (never claim all of v7x's 64 MiB).
    tile_bytes = Bt * Lt * itemsize
    pe_block_bytes = sublane * Lt * itemsize
    vmem_needed = 4 * tile_bytes + pe_bufs * pe_block_bytes + (1 << 20)
    vmem_limit = int(min(max(vmem_needed, 32 << 20), cap_limit))

    kernel = functools.partial(_pos_enc_kernel, scale=scale)
    extra = {"input_output_aliases": {0: 0}} if donate_x else {}

    out = pl.pallas_call(
        kernel,
        out_shape=jax.ShapeDtypeStruct((B_pad, L_pad), x.dtype),
        grid_spec=pltpu.PrefetchScalarGridSpec(
            num_scalar_prefetch=0,
            grid=grid,
            in_specs=[
                pl.BlockSpec((Bt, Lt), lambda l, b: (b, l)),
                pe_spec,
            ],
            out_specs=pl.BlockSpec((Bt, Lt), lambda l, b: (b, l)),
        ),
        compiler_params=pltpu.CompilerParams(
            dimension_semantics=("parallel", "parallel"),
            vmem_limit_bytes=vmem_limit,
        ),
        cost_estimate=pl.CostEstimate(
            flops=2 * B_pad * L_pad,                       # one mul + one add / elem
            transcendentals=0,
            bytes_accessed=(2 * B_pad * L_pad + L_pad) * itemsize,  # x + out + pe(once)
        ),
        **extra,
    )(x2, pe2)

    if B_pad != B or L_pad != L:
        out = out[:B, :L]
    return out.reshape(B, S, E)


if __name__ == "__main__":
    # Small config consistent with the module: max_seq_len=8, embed_size=32.
    batch, max_seq_len, embed_size = 2, 8, 32

    key = jax.random.PRNGKey(0)
    x = jax.random.normal(key, (batch, max_seq_len, embed_size), dtype=jnp.float32)

    pe = build_positional_encoding(max_seq_len, embed_size)

    out = jax.block_until_ready(positional_encoder(x, pe))

    # Reference check (plain JAX).
    ref = math.sqrt(embed_size) * x + pe
    np.testing.assert_allclose(np.asarray(out), np.asarray(ref), rtol=1e-6, atol=1e-6)

    print("KERNEL_OK")
</pallas_src>

<mosaic_0001>
module attributes {stable_mosaic.version = 11 : i64} {
  func.func @_pos_enc_kernel(%arg0: i32, %arg1: i32, %arg2: memref<2x128xf32, #tpu.memory_space<vmem>>, %arg3: memref<1x128xf32, #tpu.memory_space<vmem>>, %arg4: memref<2x128xf32, #tpu.memory_space<vmem>>) attributes {dimension_semantics = [#tpu.dimension_semantics<parallel>, #tpu.dimension_semantics<parallel>], iteration_bounds = array<i64: 2, 1>, scalar_prefetch = 0 : i64, scratch_operands = 0 : i64, tpu.core_type = #tpu.core_type<tc>, window_params = [{transform_indices = @transform_0, window_bounds = array<i64: 2, 128>}, {transform_indices = @transform_1, window_bounds = array<i64: 1, 128>}, {transform_indices = @transform_2, window_bounds = array<i64: 2, 128>}]} {
    %c0 = arith.constant 0 : index
    %c0_0 = arith.constant 0 : index
    %0 = vector.load %arg2[%c0, %c0_0] : memref<2x128xf32, #tpu.memory_space<vmem>>, vector<2x128xf32>
    %cst = arith.constant 5.65685415 : f32
    %1 = vector.broadcast %cst : f32 to vector<2x128xf32>
    %2 = arith.mulf %1, %0 : vector<2x128xf32>
    %c0_1 = arith.constant 0 : index
    %c0_2 = arith.constant 0 : index
    %3 = vector.load %arg3[%c0_1, %c0_2] : memref<1x128xf32, #tpu.memory_space<vmem>>, vector<1x128xf32>
    %4 = vector.broadcast %3 : vector<1x128xf32> to vector<2x128xf32>
    %5 = arith.addf %2, %4 : vector<2x128xf32>
    %c0_3 = arith.constant 0 : index
    %c0_4 = arith.constant 0 : index
    %6 = vector.load %arg4[%c0_3, %c0_4] : memref<2x128xf32, #tpu.memory_space<vmem>>, vector<2x128xf32>
    tpu.vector_store %arg4[%c0_3, %c0_4], %5 {strides = array<i32>} : memref<2x128xf32, #tpu.memory_space<vmem>>, vector<2x128xf32>,
    return
  }
  func.func @transform_0(%arg0: i32, %arg1: i32) -> (i32, i32) {
    %c0_i32 = arith.constant 0 : i32
    return %arg1, %arg0 : i32, i32
  }
  func.func @transform_1(%arg0: i32, %arg1: i32) -> (i32, i32) {
    %c0_i32 = arith.constant 0 : i32
    %c0_i32_0 = arith.constant 0 : i32
    return %c0_i32, %arg0 : i32, i32
  }
  func.func @transform_2(%arg0: i32, %arg1: i32) -> (i32, i32) {
    %c0_i32 = arith.constant 0 : i32
    return %arg1, %arg0 : i32, i32
  }
}

</mosaic_0001>

<bundles_post_ra>
// kernel: tpu_custom_call.1
= control target key start
LH: loop header
LB: loop body
LE: loop exit
PB: predicated region body
PF: predicated region fallthrough
CT: control target
= control target key end

     0   :  { %7 = vsyncpa [#allocation3], 0  ;;  %s693_s0 = inlined_call_operand.hbm [shape: f32[2,256], index: 0, kind: input, shape index: {}]   ;;  %s694_s1 = inlined_call_operand.vmem [shape: f32[1,256], index: 1, kind: input, shape index: {}]   ;;  %s695_s2 = inlined_call_operand.hbm [shape: f32[2,256], index: 2, kind: output, shape index: {}]  }
   0x1   :  { %9 = vsyncpa [#allocation3 + $0x1], 0 }
   0x2   :  { %10 = vsyncpa [#allocation4], 0 }
   0x3   :  { %12 = vsyncpa [#allocation4 + $0x1], 0  ;;  %s516_s9 = smov 0   ;;  %s518_s10 = smov 0  }
   0x4   :  { %s520_s11 = smov 0   ;;  %s522_s12 = smov 0  }
   0x5   :  { %s524_s13 = smov 0   ;;  %s526_s14 = smov 0  }
   0x6 LB: > { %s309_s15 = sadd.s32 4294967295, %s497_s14   ;;  %s310_s16 = sadd.s32 4294967294, %s497_s14   ;;  %s497_s14 = sphi %s526_s14, %s18_s14   ;;  %s493_s13 = sphi %s524_s13, %s711_s13   ;;  %s489_s12 = sphi %s522_s12, %s710_s12   ;;  %s485_s11 = sphi %s520_s11, %s709_s11   ;;  %s481_s10 = sphi %s518_s10, %s708_s10   ;;  %s477_s9 = sphi %s516_s9, %s707_s9  }
   0x7   : > { %s30_s17 = sadd.s32 1, %s493_s13  ;;  %s39_s18 = sadd.s32 1, %s485_s11 }
   0x8   : > { %p32_p0 = scmp.ge.s32.totalorder %s30_s17, 2  ;;  %p46_p1 = scmp.ne.s32.totalorder %s485_s11, %s481_s10 }
   0x9   : > { %p47_p2 = scmp.eq.s32.totalorder %s497_s14, 0  ;;  %p52_p3 = scmp.ne.s32.totalorder %s481_s10, %s477_s9 }
   0xa   : > { %s713_s17 = smov (%p32_p0, %s30_s17), 0  ;;  %p53_p5 = scmp.eq.s32.totalorder %s309_s15, 0 }
   0xb   : > { %p557_p4 = por %p47_p2, %p46_p1  ;;  %s35_s20 = ssub.s32 %s493_s13, %s713_s17 }
   0xc   : > { %p104_p6 = scmp.eq.s32.totalorder %s309_s15, 1  ;;  %p37_p7 = scmp.eq.s32.totalorder %s35_s20, 0 }
   0xd   : > { %p563_p8 = por %p53_p5, %p52_p3  ;;  %p110_p10 = scmp.eq.s32.totalorder %s310_s16, 1 }
   0xe   : > { %p567_p9 = por %p104_p6, %p46_p1  ;;  %p335_p13 = scmp.lt.s32.totalorder %s497_s14, 2 }
   0xf   : > { %s572_s23 = scalar_select %p37_p7, %s485_s11, %s39_s18  }
  0x10   : > { %s699_s22 = scalar_select %p567_p9, 1, 0 }
  0x11   : > { %p574_p11 = por %p110_p10, %p52_p3  ;;  %s130_s25 = sand.u32 1, %s485_s11  }
  0x12   : > { %s313_s26 = sshll.u32 %s130_s25, 1  ;;  %s314_s27 = sshll.u32 %s493_s13, 5 }
  0x13   : > { %s700_s24 = scalar_select %p574_p11, 1, 0 }
  0x14   : > { %s585_s30 = scalar_lea.hbm %s693_s0, %s314_s27  ;;  %s134_s3 = scalar_lea.vmem [#allocation2], %s313_s26 }
  0x15   : > { %s143_s4 = sshll.u32 %s134_s3, 4  ;;  %p591_p0 = pnand %p335_p13, %p557_p4  ;;  %s587_s4 = int_to_ptr.vmem [resolvable:$true] %s143_s4 }
  0x16   : > { %s131_s6 = scalar_lea.sflag [#allocation3], %s130_s25  ;;  %s385_s7 = scalar_lea.hbm %s585_s30, 32 }
  0x17   : > { %p386_p3 = scmp.ne.s32.totalorder %s585_s30, %s385_s7  ;;  %p387_p5 = pneg %p591_p0 }
  0x18   : > { %s390_s16 = scalar_lea.hbm %s693_s0, 64  ;;  %p391_p4 = scmp.lt.u32.totalorder %s585_s30, %s693_s0 }
  0x19   : > { %p388_p6 = pnand %p387_p5, %p386_p3  ;;  %p392_p10 = scmp.lt.u32.totalorder %s390_s16, %s385_s7 }
  0x1a   : > { %p394_p12 = scmp.lt.u32.totalorder %s385_s7, %s585_s30 }
  0x1b   : > { %p389_p7 = pneg %p388_p6  ;;  %p393_p13 = por %p392_p10, %p391_p4 }
  0x1d   : > { %p395_p1 = por %p394_p12, %p393_p13 }
  0x1f   : > { %p396_p2 = pnand %p395_p1, %p389_p7 }
  0x21   : > { %399 = shalt.err (!%p396_p2)
}
  0x22   : > { %s400_s20 = scalar_lea.vmem %s587_s4, 32  ;;  %s499_s25 = smov [#allocation2]  }
  0x23   : > { %p401_p3 = scmp.ne.s32.totalorder %s587_s4, %s400_s20  ;;  %s405_s26 = sshll.u32 %s499_s25, 4  ;;  %s406_s26 = int_to_ptr.vmem [resolvable:$false] %s405_s26 }
  0x24   : > { %s407_s27 = scalar_lea.vmem %s406_s26, 64  ;;  %p408_p9 = scmp.lt.s32.totalorder %s587_s4, %s406_s26 }
  0x25   : > { %p403_p6 = pnand %p401_p3, %p387_p5  ;;  %p409_p4 = scmp.lt.s32.totalorder %s407_s27, %s400_s20 }
  0x27   : > { %p404_p11 = pneg %p403_p6  ;;  %p410_p10 = por %p409_p4, %p408_p9 }
  0x29   : > { %p411_p12 = pnand %p410_p10, %p404_p11 }
  0x2b   : > { %414 = shalt.err (!%p411_p12)
}
  0x2c   : > { %330 = dma.hbm_to_vmem [thread:$0]  (!%p591_p0), %s585_s30, 32, %s587_s4, %s131_s6  }
  0x2d   : > { %p702_p1 = scmp.lt.s32.totalorder %s497_s14, 3  ;;  %p703_p2 = scmp.ge.s32.totalorder %s497_s14, 1 }
  0x2f   : > { %p155_p5 = pnand %p703_p2, %p702_p1 }
  0x30   : > { %s627_s28 = sand.u32 (!%p155_p5), 1, %s481_s10  }
  0x31   : > { %158 = sbr.rel (%p155_p5) target bundleno = 85 (0x55), region = 28  ;;  %s316_s29 = sshll.u32 (!%p155_p5), %s627_s28, 1 }
  0x32   : > { %s161_s3 = scalar_lea.sflag (!%p155_p5), [#allocation3], %s627_s28  ;;  %s164_s7 = scalar_lea.vmem (!%p155_p5), [#allocation2], %s316_s29 }
  0x38   : > { %468 = dma.done.wait (%p563_p8), %s161_s3, 32  }
  0x39   : > { %470 = vsyncadd (%p563_p8), %s161_s3, 4294967264  ;;  %p188_p9 = scmp.lt.s32.totalorder %s489_s12, 1  ;;  %v191_v0 = vld [vmem:[%s164_s7] sm:$0x3]  ;;  %s187_s8 = scalar_lea.vmem [#allocation5], %s316_s29 }
  0x3a   : > { %s218_s15 = sshll.u32 %s187_s8, 4  ;;  %s320_s16 = sshll.u32 %s489_s12, 5  ;;  %v192_v2 = vmul.f32 5.656854, %v191_v0  ;;  %s641_s15 = int_to_ptr.vmem [resolvable:$true] %s218_s15 }
  0x3b   : > { %s189_s30 = scalar_select %p188_p9, %s489_s12, 1 }
  0x3c   : > { %s646_s19 = scalar_lea.hbm %s695_s2, %s320_s16  ;;  %s203_s20 = scalar_lea.sflag [#allocation4], %s627_s28 }
  0x3d   : > { %s190_s6 = scalar_lea.vmem %s694_s1, %s189_s30  ;;  %s415_s25 = scalar_lea.vmem %s641_s15, 32 }
  0x3e   : > { %v318_v1 = vld [vmem:[%s190_s6] ss:$0 sm:$0xff]  ;;  %p416_p8 = scmp.ne.s32.totalorder %s641_s15, %s415_s25  ;;  %p704_p11 = scmp.ne.s32.totalorder %s699_s22, 0 }
  0x3f   : > { %v200_v3 = vadd.f32 %v318_v1, %v192_v2  ;;  %s500_s12 = smov [#allocation5]  }
  0x40   : > { %p417_p0 = pnand %p416_p8, %p704_p11  ;;  %s419_s26 = sshll.u32 %s500_s12, 4  ;;  %s420_s26 = int_to_ptr.vmem [resolvable:$false] %s419_s26 }
  0x41   : > { %201 = vst [vmem:[%s187_s8] sm:$0x3] %v200_v3  ;;  %s421_s27 = scalar_lea.vmem %s420_s26, 64  ;;  %p422_p13 = scmp.lt.s32.totalorder %s641_s15, %s420_s26 }
  0x42   : > { %p418_p7 = pneg %p417_p0  ;;  %p423_p3 = scmp.lt.s32.totalorder %s421_s27, %s415_s25 }
  0x44   : > { %p424_p6 = por %p423_p3, %p422_p13 }
  0x46   : > { %p425_p4 = pnand %p424_p6, %p418_p7 }
  0x48   : > { %428 = shalt.err (!%p425_p4)
}
  0x49   : > { %s429_s28 = scalar_lea.hbm %s646_s19, 32  ;;  %s433_s7 = scalar_lea.hbm %s695_s2, 64 }
  0x4a   : > { %p430_p10 = scmp.ne.s32.totalorder %s646_s19, %s429_s28  ;;  %p434_p2 = scmp.lt.u32.totalorder %s646_s19, %s695_s2 }
  0x4b   : > { %p435_p5 = scmp.lt.u32.totalorder %s433_s7, %s429_s28  ;;  %p437_p8 = scmp.lt.u32.totalorder %s429_s28, %s646_s19 }
  0x4c   : > { %p431_p12 = pnand %p430_p10, %p704_p11 }
  0x4d   : > { %p436_p9 = por %p435_p5, %p434_p2 }
  0x4e   : > { %p432_p1 = pneg %p431_p12 }
  0x4f   : > { %p438_p0 = por %p437_p8, %p436_p9 }
  0x51   : > { %p439_p7 = pnand %p438_p0, %p432_p1 }
  0x53   : > { %442 = shalt.err (!%p439_p7)
}
  0x54   : > { %325 = dma.vmem_to_hbm [thread:$0]  (%p704_p11), %s641_s15, 32, %s646_s19, %s203_s20  }
  0x55 PF: > { %s230_s5 = sand.u32 1, %s477_s9   ;;  %p705_p13 = scmp.ne.s32.totalorder %s700_s24, 0 }
  0x56   : > { %p706_p3 = scmp.ge.s32.totalorder %s497_s14, 2  ;;  %s231_s6 = scalar_lea.sflag [#allocation4], %s230_s5 }
  0x58   : > { %p332_p6 = pnand %p706_p3, %p705_p13 }
  0x5a   : > { %472 = dma.done.wait (!%p332_p6), %s231_s6, 32  }
  0x5b   : > { %474 = vsyncadd (!%p332_p6), %s231_s6, 4294967264  ;;  %s18_s14 = sadd.s32 1, %s497_s14   ;;  %s707_s9 = smov %s481_s10 }
  0x5c   : > { %p15_p4 = scmp.ge.s32.totalorder %s18_s14, 4   ;;  %s708_s10 = smov %s485_s11 }
  0x5d   : > { %s709_s11 = smov %s572_s23  ;;  %s710_s12 = smov %s493_s13 }
  0x5e   : > { %s711_s13 = smov %s713_s17  ;;  %17 = sbr.rel (!%p15_p4) target bundleno = 6 (0x6), region = 76 }
  0x65   :  { %236 = vsyncpa [#allocation3], 1 }
  0x66   :  { %238 = vsyncpa [#allocation3 + $0x1], 1 }
  0x67   :  { %239 = vsyncpa [#allocation4], 1 }
  0x68   :  { %241 = vsyncpa [#allocation4 + $0x1], 1 }

</bundles_post_ra>
